<compile_context>
chip_gen: v7x
topology: tpu7x:2x2x1
jax: 0.10.0
libtpu: 0.0.40
codegen_flags: <defaults>
</compile_context>

<pallas_src>
import functools

import jax
import jax.numpy as jnp
from jax.experimental import pallas as pl
from jax.experimental.pallas import tpu as pltpu


def _round_up(v, m):
    return (v + m - 1) // m * m


def _cdiv(a, b):
    return -(-a // b)


# ----------------------------------------------------------------------------
# Kernel: full forward pass for one batch tile (6 fused layers, dueling merge
# pre-folded into the last layer's weights).
# ----------------------------------------------------------------------------
def dueling_dqn_kernel(x_ref, w_ref, b_ref, q_ref, *, d_in, d_in_pad, lane_width):
    """x_ref: (tb, d_in)                        raw input rows (f32)
       w_ref: (d_in_pad + 5*lane_width, L)      packed, pre-transposed weights
       b_ref: (8, L)                            packed biases (rows 0..5 used)
       q_ref: (tb, L)                           Q in cols 0..n_action-1, zeros elsewhere
    """

    def silu(h):
        # SiLU(x) = x * sigmoid(x); sigmoid(x) = 0.5*(tanh(x/2)+1).
        # tanh goes to the EUP (its own VLIW slot) — no exact f32 divide on the VALU.
        return 0.5 * h * (jnp.tanh(0.5 * h) + 1.0)

    h = x_ref[...].astype(jnp.float32)
    if d_in < d_in_pad:
        # Zero-pad features in-register (one lane concat); SiLU(0)=0 keeps padding exact.
        h = jnp.concatenate(
            [h, jnp.zeros((h.shape[0], d_in_pad - d_in), h.dtype)], axis=1)

    k_sizes = (d_in_pad,) + (lane_width,) * 5
    row = 0
    for layer, k in enumerate(k_sizes):
        w = w_ref[row:row + k, :]                       # static, 8-aligned row slice
        h = jnp.dot(h.astype(w_ref.dtype), w,
                    preferred_element_type=jnp.float32) + b_ref[layer:layer + 1, :]
        if layer < len(k_sizes) - 1:                    # last layer: linear (merge folded in)
            h = silu(h)
        row += k

    q_ref[...] = h.astype(q_ref.dtype)                  # full 128-lane unmasked store


# ----------------------------------------------------------------------------
# One-time parameter packing (off the forward hot path).
#   - PyTorch Linear weights are (out, in); store (in, out) so every layer is h @ W.
#   - Value/advantage heads fused into shared matmuls ([V|A] columns, block-diag).
#   - Dueling merge folded into the final layer's weights & bias.
#   - Everything zero-padded to a lane-dense width L (multiple of 128).
# ----------------------------------------------------------------------------
def pack_params(params, state_dim, nb_neurons, n_action, *, matmul_dtype=jnp.float32):
    f32 = jnp.float32
    H = nb_neurons
    Hp = _round_up(H, 8)                       # per-branch padded width
    L = max(_round_up(2 * Hp, 128), 128)       # lane-dense width of every layer
    Dp = _round_up(state_dim, 8)               # padded input feature width
    assert n_action <= L and 2 * Hp <= L

    def wT(name):
        return jnp.asarray(params[name], f32).T          # (in, out)

    def bv(name):
        return jnp.asarray(params[name], f32)

    def place(shape, *blocks):
        out = jnp.zeros(shape, f32)
        for r, c, arr in blocks:
            out = out.at[r:r + arr.shape[0], c:c + arr.shape[1]].set(arr)
        return out

    # Final layer = dueling merge folded into a single (L, L) block:
    #   col j (j < n_action):  value rows get v2_w, advantage rows get centered a2_w_j.
    a2 = jnp.asarray(params["a2_w"], f32)                 # (n_action, H)
    a2_centered = (a2 - a2.mean(axis=0, keepdims=True)).T  # (H, n_action)
    v2_rep = jnp.broadcast_to(wT("v2_w"), (H, n_action))   # (H, n_action)

    w_layers = [
        place((Dp, L), (0, 0, wT("b0_w"))),                              # base 0
        place((L, L), (0, 0, wT("b1_w"))),                               # base 1
        place((L, L), (0, 0, wT("b2_w"))),                               # base 2
        place((L, L), (0, 0, wT("v0_w")), (0, Hp, wT("a0_w"))),          # heads 0: [V | A]
        place((L, L), (0, 0, wT("v1_w")), (Hp, Hp, wT("a1_w"))),         # heads 1: blk-diag
        place((L, L), (0, 0, v2_rep), (Hp, 0, a2_centered)),             # heads 2 + dueling
    ]
    w_slab = jnp.concatenate(w_layers, axis=0).astype(matmul_dtype)      # (Dp + 5L, L)

    def brow(*blocks):
        row = jnp.zeros((L,), f32)
        for c, arr in blocks:
            row = row.at[c:c + arr.shape[0]].set(arr)
        return row

    q_bias = bv("v2_b")[0] + bv("a2_b") - bv("a2_b").mean()              # (n_action,)
    b_rows = jnp.stack([
        brow((0, bv("b0_b"))),
        brow((0, bv("b1_b"))),
        brow((0, bv("b2_b"))),
        brow((0, bv("v0_b")), (Hp, bv("a0_b"))),
        brow((0, bv("v1_b")), (Hp, bv("a1_b"))),
        brow((0, q_bias)),
    ])
    b_slab = jnp.zeros((8, L), f32).at[:6].set(b_rows)                   # (8, L)

    return {
        "w": w_slab, "b": b_slab,
        "state_dim": state_dim, "d_in_pad": Dp,
        "lane_width": L, "n_action": n_action,
    }


# ----------------------------------------------------------------------------
# Batch tiling: few, large "parallel" grid steps; >= 2 steps once B >= 16 so
# v7x's two TensorCores both get work (costs ~0.35us on single-TC v5e/v6e).
# ----------------------------------------------------------------------------
def _choose_batch_tiling(batch, batch_block, min_steps=2):
    cap = max(8, _round_up(batch_block, 8))
    n_steps = _cdiv(batch, cap)
    if batch >= 16:
        n_steps = max(n_steps, min_steps)
    if n_steps <= 1:
        return batch, 1                      # single tile == full batch dim (no 8-row rule)
    tb = _round_up(_cdiv(batch, n_steps), 8)
    grid = _cdiv(batch, tb)
    return tb, grid


# ----------------------------------------------------------------------------
# Forward wrapper: 1-D parallel grid over the batch, weights resident in VMEM,
# lane-dense (Bp, 128) output sliced to (B, n_action) on return.
# ----------------------------------------------------------------------------
def dueling_dqn_forward(x, packed, *, batch_block=2048):
    B, d_in = x.shape
    assert d_in == packed["state_dim"]
    Dp, L, n_action = packed["d_in_pad"], packed["lane_width"], packed["n_action"]

    tb, grid = _choose_batch_tiling(B, batch_block)
    Bp = tb * grid

    xp = x if x.dtype == jnp.float32 else x.astype(jnp.float32)
    if Bp != B:
        # Rare path: only when B is not a multiple of the chosen tile.
        xp = jnp.pad(xp, ((0, Bp - B), (0, 0)))

    kernel = functools.partial(
        dueling_dqn_kernel, d_in=d_in, d_in_pad=Dp, lane_width=L)

    q_full = pl.pallas_call(
        kernel,
        out_shape=jax.ShapeDtypeStruct((Bp, L), jnp.float32),
        grid=(grid,),
        in_specs=[
            pl.BlockSpec((tb, d_in), lambda i: (i, 0)),            # x: tiled over batch
            pl.BlockSpec(packed["w"].shape, lambda i: (0, 0)),     # weights: copied once
            pl.BlockSpec(packed["b"].shape, lambda i: (0, 0)),     # biases: copied once
        ],
        out_specs=pl.BlockSpec((tb, L), lambda i: (i, 0)),         # lane-dense output
        compiler_params=pltpu.CompilerParams(
            dimension_semantics=("parallel",)),
    )(xp, packed["w"], packed["b"])

    return q_full[:B, :n_action]


# ----------------------------------------------------------------------------
# Deterministic PyTorch-shaped parameter init (nn.Linear default U(+-1/sqrt(fan_in)))
# ----------------------------------------------------------------------------
def init_params(key, state_dim, nb_neurons, n_action):
    layer_dims = {
        "b0": (nb_neurons, state_dim),
        "b1": (nb_neurons, nb_neurons),
        "b2": (nb_neurons, nb_neurons),
        "v0": (nb_neurons, nb_neurons),
        "v1": (nb_neurons, nb_neurons),
        "v2": (1, nb_neurons),
        "a0": (nb_neurons, nb_neurons),
        "a1": (nb_neurons, nb_neurons),
        "a2": (n_action, nb_neurons),
    }
    params = {}
    for name, (out_f, in_f) in layer_dims.items():
        key, kw, kb = jax.random.split(key, 3)
        bound = 1.0 / jnp.sqrt(jnp.float32(in_f))
        params[f"{name}_w"] = jax.random.uniform(
            kw, (out_f, in_f), jnp.float32, -bound, bound)
        params[f"{name}_b"] = jax.random.uniform(
            kb, (out_f,), jnp.float32, -bound, bound)
    return params


# ----------------------------------------------------------------------------
# Pure-JAX reference (PyTorch semantics) for correctness checking.
# ----------------------------------------------------------------------------
def reference_forward(x, params):
    def lin(h, name):
        return h @ params[f"{name}_w"].T + params[f"{name}_b"]

    def silu(h):
        return h * jax.nn.sigmoid(h)

    y = silu(lin(x, "b0")); y = silu(lin(y, "b1")); y = silu(lin(y, "b2"))
    v = silu(lin(y, "v0")); v = silu(lin(v, "v1")); v = lin(v, "v2")
    a = silu(lin(y, "a0")); a = silu(lin(a, "a1")); a = lin(a, "a2")
    return v + (a - a.mean(axis=1, keepdims=True))


if __name__ == "__main__":
    # HIVPatient env: observation dim 6, 4 discrete actions, 32 hidden units.
    STATE_DIM, NB_NEURONS, N_ACTION = 6, 32, 4

    key = jax.random.PRNGKey(0)
    key, kx1, kx2 = jax.random.split(key, 3)
    params = init_params(key, STATE_DIM, NB_NEURONS, N_ACTION)

    # One-time relayout / head fusion / dueling-merge folding / slab packing.
    packed = pack_params(params, STATE_DIM, NB_NEURONS, N_ACTION)

    # Small batch (single grid step, no padding/copies in the wrapper).
    x = jax.random.normal(kx1, (2, STATE_DIM), jnp.float32)
    q = jax.block_until_ready(dueling_dqn_forward(x, packed))
    q_ref = reference_forward(x, params)
    assert q.shape == (2, N_ACTION)
    assert jnp.allclose(q, q_ref, atol=1e-4, rtol=1e-4), (q, q_ref)

    # Medium batch: default heuristic gives 2 balanced tiles (dual-TC friendly);
    # explicit small batch_block exercises a 3-step grid as well.
    x2 = jax.random.normal(kx2, (48, STATE_DIM), jnp.float32)
    q2 = jax.block_until_ready(dueling_dqn_forward(x2, packed))
    q3 = jax.block_until_ready(dueling_dqn_forward(x2, packed, batch_block=16))
    q2_ref = reference_forward(x2, params)
    assert q2.shape == (48, N_ACTION)
    assert jnp.allclose(q2, q2_ref, atol=1e-4, rtol=1e-4)
    assert jnp.allclose(q3, q2_ref, atol=1e-4, rtol=1e-4)

    print("KERNEL_OK")
</pallas_src>

<mosaic_0001>
module attributes {stable_mosaic.version = 11 : i64} {
  func.func @dueling_dqn_kernel(%arg0: i32, %arg1: memref<2x6xf32, #tpu.memory_space<vmem>>, %arg2: memref<648x128xf32, #tpu.memory_space<vmem>>, %arg3: memref<8x128xf32, #tpu.memory_space<vmem>>, %arg4: memref<2x128xf32, #tpu.memory_space<vmem>>) attributes {dimension_semantics = [#tpu.dimension_semantics<parallel>], iteration_bounds = array<i64: 1>, scalar_prefetch = 0 : i64, scratch_operands = 0 : i64, tpu.core_type = #tpu.core_type<tc>, window_params = [{transform_indices = @transform_0, window_bounds = array<i64: 2, 6>}, {pipeline_mode = #tpu.pipeline_mode<synchronous>, transform_indices = @transform_1, window_bounds = array<i64: 648, 128>}, {pipeline_mode = #tpu.pipeline_mode<synchronous>, transform_indices = @transform_2, window_bounds = array<i64: 8, 128>}, {transform_indices = @transform_3, window_bounds = array<i64: 2, 128>}]} {
    %c0 = arith.constant 0 : index
    %c0_0 = arith.constant 0 : index
    %0 = vector.load %arg1[%c0, %c0_0] : memref<2x6xf32, #tpu.memory_space<vmem>>, vector<2x6xf32>
    %cst = arith.constant 0.000000e+00 : f32
    %1 = vector.broadcast %cst : f32 to vector<2x2xf32>
    %2 = tpu.concatenate %0, %1 in 1 : vector<2x6xf32>, vector<2x2xf32> -> vector<2x8xf32>
    %c0_1 = arith.constant 0 : index
    %c0_2 = arith.constant 0 : index
    %3 = vector.load %arg2[%c0_1, %c0_2] : memref<648x128xf32, #tpu.memory_space<vmem>>, vector<8x128xf32>
    %cst_3 = arith.constant dense<0.000000e+00> : vector<2x128xf32>
    %4 = tpu.matmul %2, %3, %cst_3 {dimension_numbers = #tpu.dot_dimension_numbers<[1], [0], [0], [1], [0, 0, 1, 1], [], []>} : vector<2x8xf32>, vector<8x128xf32>, vector<2x128xf32> -> vector<2x128xf32>
    %c0_4 = arith.constant 0 : index
    %c0_5 = arith.constant 0 : index
    %5 = vector.load %arg3[%c0_4, %c0_5] : memref<8x128xf32, #tpu.memory_space<vmem>>, vector<1x128xf32>
    %6 = vector.broadcast %5 : vector<1x128xf32> to vector<2x128xf32>
    %7 = arith.addf %4, %6 : vector<2x128xf32>
    %cst_6 = arith.constant 5.000000e-01 : f32
    %8 = vector.broadcast %cst_6 : f32 to vector<2x128xf32>
    %9 = arith.mulf %8, %7 : vector<2x128xf32>
    %cst_7 = arith.constant 5.000000e-01 : f32
    %10 = vector.broadcast %cst_7 : f32 to vector<2x128xf32>
    %11 = arith.mulf %10, %7 : vector<2x128xf32>
    %12 = math.tanh %11 : vector<2x128xf32>
    %cst_8 = arith.constant 1.000000e+00 : f32
    %13 = vector.broadcast %cst_8 : f32 to vector<2x128xf32>
    %14 = arith.addf %12, %13 : vector<2x128xf32>
    %15 = arith.mulf %9, %14 : vector<2x128xf32>
    %c8 = arith.constant 8 : index
    %c0_9 = arith.constant 0 : index
    %16 = vector.load %arg2[%c8, %c0_9] : memref<648x128xf32, #tpu.memory_space<vmem>>, vector<128x128xf32>
    %cst_10 = arith.constant dense<0.000000e+00> : vector<2x128xf32>
    %17 = tpu.matmul %15, %16, %cst_10 {dimension_numbers = #tpu.dot_dimension_numbers<[1], [0], [0], [1], [0, 0, 1, 1], [], []>} : vector<2x128xf32>, vector<128x128xf32>, vector<2x128xf32> -> vector<2x128xf32>
    %c1 = arith.constant 1 : index
    %c0_11 = arith.constant 0 : index
    %18 = vector.load %arg3[%c1, %c0_11] : memref<8x128xf32, #tpu.memory_space<vmem>>, vector<1x128xf32>
    %19 = vector.broadcast %18 : vector<1x128xf32> to vector<2x128xf32>
    %20 = arith.addf %17, %19 : vector<2x128xf32>
    %cst_12 = arith.constant 5.000000e-01 : f32
    %21 = vector.broadcast %cst_12 : f32 to vector<2x128xf32>
    %22 = arith.mulf %21, %20 : vector<2x128xf32>
    %cst_13 = arith.constant 5.000000e-01 : f32
    %23 = vector.broadcast %cst_13 : f32 to vector<2x128xf32>
    %24 = arith.mulf %23, %20 : vector<2x128xf32>
    %25 = math.tanh %24 : vector<2x128xf32>
    %cst_14 = arith.constant 1.000000e+00 : f32
    %26 = vector.broadcast %cst_14 : f32 to vector<2x128xf32>
    %27 = arith.addf %25, %26 : vector<2x128xf32>
    %28 = arith.mulf %22, %27 : vector<2x128xf32>
    %c136 = arith.constant 136 : index
    %c0_15 = arith.constant 0 : index
    %29 = vector.load %arg2[%c136, %c0_15] : memref<648x128xf32, #tpu.memory_space<vmem>>, vector<128x128xf32>
    %cst_16 = arith.constant dense<0.000000e+00> : vector<2x128xf32>
    %30 = tpu.matmul %28, %29, %cst_16 {dimension_numbers = #tpu.dot_dimension_numbers<[1], [0], [0], [1], [0, 0, 1, 1], [], []>} : vector<2x128xf32>, vector<128x128xf32>, vector<2x128xf32> -> vector<2x128xf32>
    %c2 = arith.constant 2 : index
    %c0_17 = arith.constant 0 : index
    %31 = vector.load %arg3[%c2, %c0_17] : memref<8x128xf32, #tpu.memory_space<vmem>>, vector<1x128xf32>
    %32 = vector.broadcast %31 : vector<1x128xf32> to vector<2x128xf32>
    %33 = arith.addf %30, %32 : vector<2x128xf32>
    %cst_18 = arith.constant 5.000000e-01 : f32
    %34 = vector.broadcast %cst_18 : f32 to vector<2x128xf32>
    %35 = arith.mulf %34, %33 : vector<2x128xf32>
    %cst_19 = arith.constant 5.000000e-01 : f32
    %36 = vector.broadcast %cst_19 : f32 to vector<2x128xf32>
    %37 = arith.mulf %36, %33 : vector<2x128xf32>
    %38 = math.tanh %37 : vector<2x128xf32>
    %cst_20 = arith.constant 1.000000e+00 : f32
    %39 = vector.broadcast %cst_20 : f32 to vector<2x128xf32>
    %40 = arith.addf %38, %39 : vector<2x128xf32>
    %41 = arith.mulf %35, %40 : vector<2x128xf32>
    %c264 = arith.constant 264 : index
    %c0_21 = arith.constant 0 : index
    %42 = vector.load %arg2[%c264, %c0_21] : memref<648x128xf32, #tpu.memory_space<vmem>>, vector<128x128xf32>
    %cst_22 = arith.constant dense<0.000000e+00> : vector<2x128xf32>
    %43 = tpu.matmul %41, %42, %cst_22 {dimension_numbers = #tpu.dot_dimension_numbers<[1], [0], [0], [1], [0, 0, 1, 1], [], []>} : vector<2x128xf32>, vector<128x128xf32>, vector<2x128xf32> -> vector<2x128xf32>
    %c3 = arith.constant 3 : index
    %c0_23 = arith.constant 0 : index
    %44 = vector.load %arg3[%c3, %c0_23] : memref<8x128xf32, #tpu.memory_space<vmem>>, vector<1x128xf32>
    %45 = vector.broadcast %44 : vector<1x128xf32> to vector<2x128xf32>
    %46 = arith.addf %43, %45 : vector<2x128xf32>
    %cst_24 = arith.constant 5.000000e-01 : f32
    %47 = vector.broadcast %cst_24 : f32 to vector<2x128xf32>
    %48 = arith.mulf %47, %46 : vector<2x128xf32>
    %cst_25 = arith.constant 5.000000e-01 : f32
    %49 = vector.broadcast %cst_25 : f32 to vector<2x128xf32>
    %50 = arith.mulf %49, %46 : vector<2x128xf32>
    %51 = math.tanh %50 : vector<2x128xf32>
    %cst_26 = arith.constant 1.000000e+00 : f32
    %52 = vector.broadcast %cst_26 : f32 to vector<2x128xf32>
    %53 = arith.addf %51, %52 : vector<2x128xf32>
    %54 = arith.mulf %48, %53 : vector<2x128xf32>
    %c392 = arith.constant 392 : index
    %c0_27 = arith.constant 0 : index
    %55 = vector.load %arg2[%c392, %c0_27] : memref<648x128xf32, #tpu.memory_space<vmem>>, vector<128x128xf32>
    %cst_28 = arith.constant dense<0.000000e+00> : vector<2x128xf32>
    %56 = tpu.matmul %54, %55, %cst_28 {dimension_numbers = #tpu.dot_dimension_numbers<[1], [0], [0], [1], [0, 0, 1, 1], [], []>} : vector<2x128xf32>, vector<128x128xf32>, vector<2x128xf32> -> vector<2x128xf32>
    %c4 = arith.constant 4 : index
    %c0_29 = arith.constant 0 : index
    %57 = vector.load %arg3[%c4, %c0_29] : memref<8x128xf32, #tpu.memory_space<vmem>>, vector<1x128xf32>
    %58 = vector.broadcast %57 : vector<1x128xf32> to vector<2x128xf32>
    %59 = arith.addf %56, %58 : vector<2x128xf32>
    %cst_30 = arith.constant 5.000000e-01 : f32
    %60 = vector.broadcast %cst_30 : f32 to vector<2x128xf32>
    %61 = arith.mulf %60, %59 : vector<2x128xf32>
    %cst_31 = arith.constant 5.000000e-01 : f32
    %62 = vector.broadcast %cst_31 : f32 to vector<2x128xf32>
    %63 = arith.mulf %62, %59 : vector<2x128xf32>
    %64 = math.tanh %63 : vector<2x128xf32>
    %cst_32 = arith.constant 1.000000e+00 : f32
    %65 = vector.broadcast %cst_32 : f32 to vector<2x128xf32>
    %66 = arith.addf %64, %65 : vector<2x128xf32>
    %67 = arith.mulf %61, %66 : vector<2x128xf32>
    %c520 = arith.constant 520 : index
    %c0_33 = arith.constant 0 : index
    %68 = vector.load %arg2[%c520, %c0_33] : memref<648x128xf32, #tpu.memory_space<vmem>>, vector<128x128xf32>
    %cst_34 = arith.constant dense<0.000000e+00> : vector<2x128xf32>
    %69 = tpu.matmul %67, %68, %cst_34 {dimension_numbers = #tpu.dot_dimension_numbers<[1], [0], [0], [1], [0, 0, 1, 1], [], []>} : vector<2x128xf32>, vector<128x128xf32>, vector<2x128xf32> -> vector<2x128xf32>
    %c5 = arith.constant 5 : index
    %c0_35 = arith.constant 0 : index
    %70 = vector.load %arg3[%c5, %c0_35] : memref<8x128xf32, #tpu.memory_space<vmem>>, vector<1x128xf32>
    %71 = vector.broadcast %70 : vector<1x128xf32> to vector<2x128xf32>
    %72 = arith.addf %69, %71 : vector<2x128xf32>
    %c0_36 = arith.constant 0 : index
    %c0_37 = arith.constant 0 : index
    %73 = vector.load %arg4[%c0_36, %c0_37] : memref<2x128xf32, #tpu.memory_space<vmem>>, vector<2x128xf32>
    tpu.vector_store %arg4[%c0_36, %c0_37], %72 {strides = array<i32>} : memref<2x128xf32, #tpu.memory_space<vmem>>, vector<2x128xf32>,
    return
  }
  func.func @transform_0(%arg0: i32) -> (i32, i32) {
    %c0_i32 = arith.constant 0 : i32
    %c0_i32_0 = arith.constant 0 : i32
    return %arg0, %c0_i32 : i32, i32
  }
  func.func @transform_1(%arg0: i32) -> (i32, i32) {
    %c0_i32 = arith.constant 0 : i32
    %c0_i32_0 = arith.constant 0 : i32
    %c0_i32_1 = arith.constant 0 : i32
    return %c0_i32, %c0_i32_0 : i32, i32
  }
  func.func @transform_2(%arg0: i32) -> (i32, i32) {
    %c0_i32 = arith.constant 0 : i32
    %c0_i32_0 = arith.constant 0 : i32
    %c0_i32_1 = arith.constant 0 : i32
    return %c0_i32, %c0_i32_0 : i32, i32
  }
  func.func @transform_3(%arg0: i32) -> (i32, i32) {
    %c0_i32 = arith.constant 0 : i32
    %c0_i32_0 = arith.constant 0 : i32
    return %arg0, %c0_i32 : i32, i32
  }
}

</mosaic_0001>

<bundles_post_ra>
// kernel: tpu_custom_call.1
= control target key start
LH: loop header
LB: loop body
LE: loop exit
PB: predicated region body
PF: predicated region fallthrough
CT: control target
= control target key end

     0   :  { %8 = vsyncpa [#allocation3], 0  ;;  %s1264_s0 = inlined_call_operand.hbm [shape: f32[2,6], index: 0, kind: input, shape index: {}]   ;;  %s1265_s1 = inlined_call_operand.hbm [shape: f32[648,128], index: 1, kind: input, shape index: {}]   ;;  %s1266_s2 = inlined_call_operand.hbm [shape: f32[8,128], index: 2, kind: input, shape index: {}]   ;;  %s1267_s3 = inlined_call_operand.hbm [shape: f32[2,128], index: 3, kind: output, shape index: {}]  }
   0x1   :  { %9 = vsyncpa [#allocation6], 0 }
   0x2   :  { %10 = vsyncpa [#allocation4], 0  ;;  %s1134_s12 = smov [#allocation5]   ;;  %s1040_s16 = scalar_lea.hbm %s1265_s1, 10368 }
   0x3   :  { %s26_s13 = sshll.u32 %s1134_s12, 4  ;;  %p1041_p0 = scmp.ne.s32.totalorder %s1265_s1, %s1040_s16  ;;  %s27_s13 = int_to_ptr.vmem [resolvable:$true] %s26_s13 }
   0x4   :  { %p1044_p1 = scmp.lt.u32.totalorder %s1040_s16, %s1265_s1 }
   0x6   :  { %p1046_p2 = pnand %p1044_p1, %p1041_p0 }
   0x8   :  { %1049 = shalt.err (!%p1046_p2)
}
   0x9   :  { %s1050_s21 = scalar_lea.vmem %s27_s13, 10368  ;;  %p1055_p4 = scmp.lt.s32.totalorder %s27_s13, %s27_s13 }
   0xa   :  { %p1051_p3 = scmp.ne.s32.totalorder %s27_s13, %s1050_s21  ;;  %p1056_p5 = scmp.lt.s32.totalorder %s1050_s21, %s1050_s21 }
   0xc   :  { %p1057_p6 = por %p1056_p5, %p1055_p4 }
   0xe   :  { %p1058_p7 = pnand %p1057_p6, %p1051_p3 }
  0x10   :  { %1061 = shalt.err (!%p1058_p7)
}
  0x11   :  { %s1135_s22 = smov 128   ;;  %s1136_s23 = smov 8  }
  0x12   :  { %32 = dma.hbm_to_vmem [thread:$0]  %s1265_s1, 10368, %s27_s13, [#allocation6], %s1135_s22, %s1135_s22, %s1136_s23  }
  0x13   :  { %s1137_s26 = smov [#allocation2]   ;;  %s1138_s28 = smov [#allocation7]  }
  0x14   :  { %s17_s27 = sshll.u32 %s1137_s26, 4  ;;  %s39_s29 = sshll.u32 %s1138_s28, 4  ;;  %s18_s27 = int_to_ptr.vmem [resolvable:$true] %s17_s27  ;;  %s40_s29 = int_to_ptr.vmem [resolvable:$true] %s39_s29 }
  0x15   :  { %s1062_s5 = scalar_lea.hbm %s1264_s0, 32 }
  0x16   :  { %p1063_p8 = scmp.ne.s32.totalorder %s1264_s0, %s1062_s5  ;;  %p1066_p9 = scmp.lt.u32.totalorder %s1062_s5, %s1264_s0 }
  0x18   :  { %p1068_p10 = pnand %p1066_p9, %p1063_p8 }
  0x1a   :  { %1071 = shalt.err (!%p1068_p10)
}
  0x1b   :  { %s1072_s1 = scalar_lea.vmem %s18_s27, 32  ;;  %p1077_p12 = scmp.lt.s32.totalorder %s18_s27, %s18_s27 }
  0x1c   :  { %p1073_p11 = scmp.ne.s32.totalorder %s18_s27, %s1072_s1  ;;  %p1078_p13 = scmp.lt.s32.totalorder %s1072_s1, %s1072_s1 }
  0x1e   :  { %p1079_p0 = por %p1078_p13, %p1077_p12 }
  0x20   :  { %p1080_p1 = pnand %p1079_p0, %p1073_p11 }
  0x22   :  { %1083 = shalt.err (!%p1080_p1)
}
  0x23   :  { %20 = dma.hbm_to_vmem [thread:$0]  %s1264_s0, 32, %s18_s27, [#allocation3]  }
  0x24   :  { %s1084_s14 = scalar_lea.hbm %s1266_s2, 128 }
  0x25   :  { %p1085_p2 = scmp.ne.s32.totalorder %s1266_s2, %s1084_s14  ;;  %p1088_p3 = scmp.lt.u32.totalorder %s1084_s14, %s1266_s2 }
  0x27   :  { %p1090_p4 = pnand %p1088_p3, %p1085_p2 }
  0x29   :  { %1093 = shalt.err (!%p1090_p4)
}
  0x2a   :  { %s1094_s19 = scalar_lea.vmem %s40_s29, 128  ;;  %p1099_p6 = scmp.lt.s32.totalorder %s40_s29, %s40_s29 }
  0x2b   :  { %p1095_p5 = scmp.ne.s32.totalorder %s40_s29, %s1094_s19  ;;  %p1100_p7 = scmp.lt.s32.totalorder %s1094_s19, %s1094_s19 }
  0x2d   :  { %p1101_p8 = por %p1100_p7, %p1099_p6 }
  0x2f   :  { %p1102_p9 = pnand %p1101_p8, %p1095_p5 }
  0x31   :  { %1105 = shalt.err (!%p1102_p9)
}
  0x32   :  { %42 = dma.hbm_to_vmem [thread:$0]  %s1266_s2, 128, %s40_s29, [#allocation6]  }
  0x33   :  { %1128 = dma.done.wait [#allocation3], 32  }
  0x34   :  { %1129 = vsyncadd [#allocation3], 4294967264 }
  0x35   :  { %1130 = dma.done.wait [#allocation6], 10496  }
  0x36   :  { %1131 = vsyncadd [#allocation6], 4294956800  ;;  %v1139_v0 = vmov 0.0   ;;  %vm1140_vm0 = vmmov 0   ;;  %v1141_v1 = vmov 0.0|0.0   ;;  %vm53_vm1 = vcmask 48128  }
  0x37   :  { %721 = vmatprep.subr.mxu0 %v1139_v0  ;;  %723 = vmatprep.mubr.msk.f32.mxu0 %vm1140_vm0, %v1139_v0  ;;  %vm61_vm2 = vcmask 64512   ;;  %v55_v2 = vld [vmem:[#allocation5] sm:$0xff]  ;;  %v52_v3 = vld [vmem:[#allocation2] sm:$0x3]  ;;  %v139_v4 = vld [vmem:[#allocation5 + $0x8] sm:$0xff]  ;;  %s1142_s2 = smov [#allocation8]  }
  0x38   :  { %901 = vmatprep.subr.bf16.mxu1 %v1141_v1  ;;  %758 = vmatprep.mubr.msk.f32.mxu1 %vm1140_vm0, %v1139_v0  ;;  %v54_v5 = vsel %vm53_vm1, %v52_v3, 0.0  ;;  %v140_v6 = vld [vmem:[#allocation5 + $0x10] sm:$0xff]  ;;  %v141_v7 = vld [vmem:[#allocation5 + $0x18] sm:$0xff]  ;;  %v142_v8 = vld [vmem:[#allocation5 + $0x20] sm:$0xff]  ;;  %s617_s21 = sshll.u32 %s1142_s2, 4  ;;  %s618_s21 = int_to_ptr.vmem [resolvable:$true] %s617_s21 }
  0x39   :  { %722 = vmatpush3.msra.mxu0 %v55_v2  ;;  %v902_v9 = vpack.c.bf16 %v140_v6, %v139_v4  ;;  %v905_v10 = vpack.c.bf16 %v142_v8, %v141_v7  ;;  %v143_v11 = vld [vmem:[#allocation5 + $0x28] sm:$0xff]  ;;  %v144_v12 = vld [vmem:[#allocation5 + $0x30] sm:$0xff]  ;;  %v145_v14 = vld [vmem:[#allocation5 + $0x38] sm:$0xff]  ;;  %s1106_s22 = scalar_lea.vmem %s618_s21, 32  ;;  %p1111_p11 = scmp.lt.s32.totalorder %s618_s21, %s618_s21 }
  0x3a   :  { %724 = vmatmul.mubr.msk.f32.vlgmr.msra.gmra.mrb[0].mxu0 %vm61_vm2, %v54_v5  ;;  %925 = vmatprep.subr.bf16.mxu0 %v1141_v1  ;;  %v908_v13 = vpack.c.bf16 %v144_v12, %v143_v11  ;;  %v146_v15 = vld [vmem:[#allocation5 + $0x40] sm:$0xff]  ;;  %v147_v17 = vld [vmem:[#allocation5 + $0x48] sm:$0xff]  ;;  %v148_v18 = vld [vmem:[#allocation5 + $0x50] sm:$0xff]  ;;  %p1107_p10 = scmp.ne.s32.totalorder %s618_s21, %s1106_s22  ;;  %p1112_p12 = scmp.lt.s32.totalorder %s1106_s22, %s1106_s22 }
  0x3b   :  { %793 = vmatprep.mubr.msk.f32.mxu0 %vm1140_vm0, %v1139_v0  ;;  %903 = vmatpush3.bf16.msra.mxu1 %v902_v9  ;;  %v911_v16 = vpack.c.bf16 %v146_v15, %v145_v14  ;;  %v914_v19 = vpack.c.bf16 %v148_v18, %v147_v17  ;;  %v149_v20 = vld [vmem:[#allocation5 + $0x58] sm:$0xff]  ;;  %v150_v21 = vld [vmem:[#allocation5 + $0x60] sm:$0xff]  ;;  %v151_v23 = vld [vmem:[#allocation5 + $0x68] sm:$0xff] }
  0x3c   :  { %904 = vmatprep.subr.bf16.mxu1 %v1141_v1  ;;  %v917_v22 = vpack.c.bf16 %v150_v21, %v149_v20  ;;  %v152_v24 = vld [vmem:[#allocation5 + $0x70] sm:$0xff]  ;;  %v153_v26 = vld [vmem:[#allocation5 + $0x78] sm:$0xff]  ;;  %v154_v27 = vld [vmem:[#allocation5 + $0x80] sm:$0xff]  ;;  %p1113_p13 = por %p1112_p12, %p1111_p11 }
  0x3d   :  { %v920_v25 = vpack.c.bf16 %v152_v24, %v151_v23  ;;  %v923_v28 = vpack.c.bf16 %v154_v27, %v153_v26  ;;  %v234_v29 = vld [vmem:[#allocation5 + $0x88] sm:$0xff]  ;;  %v235_v30 = vld [vmem:[#allocation5 + $0x90] sm:$0xff]  ;;  %v236_v31 = vld [vmem:[#allocation5 + $0x98] sm:$0xff] }
  0x3e   :  { %v926_v32 = vpack.c.bf16 %v235_v30, %v234_v29  ;;  %v237_v33 = vld [vmem:[#allocation5 + $0xa0] sm:$0xff]  ;;  %v238_v35 = vld [vmem:[#allocation5 + $0xa8] sm:$0xff]  ;;  %v239_v36 = vld [vmem:[#allocation5 + $0xb0] sm:$0xff]  ;;  %p1114_p0 = pnand %p1113_p13, %p1107_p10 }
  0x3f   :  { %906 = vmatpush3.bf16.msra.mxu1 %v905_v10  ;;  %v929_v34 = vpack.c.bf16 %v237_v33, %v236_v31  ;;  %v932_v37 = vpack.c.bf16 %v239_v36, %v238_v35  ;;  %v627_v38 = vld [vmem:[#allocation7] ss:$0 sm:$0xff]  ;;  %v240_v46 = vld [vmem:[#allocation5 + $0xb8] sm:$0xff]  ;;  %v241_v47 = vld [vmem:[#allocation5 + $0xc0] sm:$0xff] }
  0x40   :  { %907 = vmatprep.subr.bf16.mxu1 %v1141_v1  ;;  %927 = vmatpush3.bf16.msra.mxu0 %v926_v32  ;;  %v935_v48 = vpack.c.bf16 %v241_v47, %v240_v46  ;;  %v242_v49 = vld [vmem:[#allocation5 + $0xc8] sm:$0xff]  ;;  %v243_v50 = vld [vmem:[#allocation5 + $0xd0] sm:$0xff]  ;;  %v244_v52 = vld [vmem:[#allocation5 + $0xd8] sm:$0xff] }
  0x41   :  { %928 = vmatprep.subr.bf16.mxu0 %v1141_v1  ;;  %v938_v51 = vpack.c.bf16 %v243_v50, %v242_v49  ;;  %v245_v53 = vld [vmem:[#allocation5 + $0xe0] sm:$0xff]  ;;  %v246_v55 = vld [vmem:[#allocation5 + $0xe8] sm:$0xff]  ;;  %v247_v56 = vld [vmem:[#allocation5 + $0xf0] sm:$0xff] }
  0x42   :  { %v941_v54 = vpack.c.bf16 %v245_v53, %v244_v52  ;;  %v944_v57 = vpack.c.bf16 %v247_v56, %v246_v55  ;;  %v248_v58 = vld [vmem:[#allocation5 + $0xf8] sm:$0xff]  ;;  %v249_v59 = vld [vmem:[#allocation5 + $0x100] sm:$0xff]  ;;  %v329_v61 = vld [vmem:[#allocation5 + $0x108] sm:$0xff] }
  0x43   :  { %909 = vmatpush3.bf16.msra.mxu1 %v908_v13  ;;  %v947_v60 = vpack.c.bf16 %v249_v59, %v248_v58  ;;  %v330_v62 = vld [vmem:[#allocation5 + $0x110] sm:$0xff]  ;;  %v331_v63 = vld [vmem:[#allocation5 + $0x118] sm:$0xff]  ;;  %v332_v3 = vld [vmem:[#allocation5 + $0x120] sm:$0xff] }
  0x44   :  { %910 = vmatprep.subr.bf16.mxu1 %v1141_v1  ;;  %930 = vmatpush3.bf16.msra.mxu0 %v929_v34  ;;  %v950_v2 = vpack.c.bf16 %v330_v62, %v329_v61  ;;  %v953_v4 = vpack.c.bf16 %v332_v3, %v331_v63  ;;  %v333_v5 = vld [vmem:[#allocation5 + $0x128] sm:$0xff]  ;;  %v334_v6 = vld [vmem:[#allocation5 + $0x130] sm:$0xff]  ;;  %v336_v17 = vld [vmem:[#allocation5 + $0x140] sm:$0xff] }
  0x45   :  { %931 = vmatprep.subr.bf16.mxu0 %v1141_v1  ;;  %v956_v7 = vpack.c.bf16 %v334_v6, %v333_v5  ;;  %v629_v8 = vld [vmem:[#allocation7 + $0x1] ss:$0 sm:$0xff]  ;;  %v338_v20 = vld [vmem:[#allocation5 + $0x150] sm:$0xff]  ;;  %v340_v23 = vld [vmem:[#allocation5 + $0x160] sm:$0xff] }
  0x46   :  { %v342_v26 = vld [vmem:[#allocation5 + $0x170] sm:$0xff]  ;;  %v344_v29 = vld [vmem:[#allocation5 + $0x180] sm:$0xff]  ;;  %v424_v31 = vld [vmem:[#allocation5 + $0x188] sm:$0xff] }
  0x47   :  { %912 = vmatpush3.bf16.msra.mxu1 %v911_v16  ;;  %v335_v16 = vld [vmem:[#allocation5 + $0x138] sm:$0xff]  ;;  %v425_v32 = vld [vmem:[#allocation5 + $0x190] sm:$0xff]  ;;  %v427_v35 = vld [vmem:[#allocation5 + $0x1a0] sm:$0xff] }
  0x48   :  { %913 = vmatprep.subr.bf16.mxu1 %v1141_v1  ;;  %933 = vmatpush3.bf16.msra.mxu0 %v932_v37  ;;  %v959_v18 = vpack.c.bf16 %v336_v17, %v335_v16  ;;  %v426_v33 = vld [vmem:[#allocation5 + $0x198] sm:$0xff]  ;;  %v974_v34 = vpack.c.bf16 %v425_v32, %v424_v31  ;;  %v428_v37 = vld [vmem:[#allocation5 + $0x1a8] sm:$0xff]  ;;  %v431_v49 = vld [vmem:[#allocation5 + $0x1c0] sm:$0xff] }
  0x49   :  { %934 = vmatprep.subr.bf16.mxu0 %v1141_v1  ;;  %v977_v36 = vpack.c.bf16 %v427_v35, %v426_v33  ;;  %v433_v52 = vld [vmem:[#allocation5 + $0x1d0] sm:$0xff]  ;;  %v435_v55 = vld [vmem:[#allocation5 + $0x1e0] sm:$0xff]  ;;  %v438_v59 = vld [vmem:[#allocation5 + $0x1f8] sm:$0xff] }
  0x4a   :  { %v519_v62 = vld [vmem:[#allocation5 + $0x208] sm:$0xff]  ;;  %v520_v63 = vld [vmem:[#allocation5 + $0x210] sm:$0xff]  ;;  %v525_v17 = vld [vmem:[#allocation5 + $0x238] sm:$0xff] }
  0x4b   :  { %915 = vmatpush3.bf16.msra.mxu1 %v914_v19  ;;  %v337_v19 = vld [vmem:[#allocation5 + $0x148] sm:$0xff]  ;;  %v998_v3 = vpack.c.bf16 %v520_v63, %v519_v62 }
  0x4c   :  { %916 = vmatprep.subr.bf16.mxu1 %v1141_v1  ;;  %936 = vmatpush3.bf16.msra.mxu0 %v935_v48  ;;  %v962_v21 = vpack.c.bf16 %v338_v20, %v337_v19  ;;  %v430_v48 = vld [vmem:[#allocation5 + $0x1b8] sm:$0xff]  ;;  %v523_v6 = vld [vmem:[#allocation5 + $0x228] sm:$0xff] }
  0x4d   :  { %937 = vmatprep.subr.bf16.mxu0 %v1141_v1  ;;  %v983_v50 = vpack.c.bf16 %v431_v49, %v430_v48  ;;  %v527_v20 = vld [vmem:[#allocation5 + $0x248] sm:$0xff] }
  0x4e   :  { %v632_v32 = vld [vmem:[#allocation7 + $0x4] ss:$0 sm:$0xff] }
  0x4f   :  { %918 = vmatpush3.bf16.msra.mxu1 %v917_v22  ;;  %v339_v22 = vld [vmem:[#allocation5 + $0x158] sm:$0xff] }
  0x50   :  { %919 = vmatprep.subr.bf16.mxu1 %v1141_v1  ;;  %939 = vmatpush3.bf16.msra.mxu0 %v938_v51  ;;  %v965_v24 = vpack.c.bf16 %v340_v23, %v339_v22  ;;  %v432_v51 = vld [vmem:[#allocation5 + $0x1c8] sm:$0xff]  ;;  %v529_v23 = vld [vmem:[#allocation5 + $0x258] sm:$0xff] }
  0x51   :  { %940 = vmatprep.subr.bf16.mxu0 %v1141_v1  ;;  %v986_v53 = vpack.c.bf16 %v433_v52, %v432_v51 }
  0x53   :  { %921 = vmatpush3.bf16.msra.mxu1 %v920_v25  ;;  %v341_v25 = vld [vmem:[#allocation5 + $0x168] sm:$0xff] }
  0x54   :  { %922 = vmatprep.subr.bf16.mxu1 %v1141_v1  ;;  %942 = vmatpush3.bf16.msra.mxu0 %v941_v54  ;;  %v968_v27 = vpack.c.bf16 %v342_v26, %v341_v25  ;;  %v434_v54 = vld [vmem:[#allocation5 + $0x1d8] sm:$0xff]  ;;  %v531_v26 = vld [vmem:[#allocation5 + $0x268] sm:$0xff] }
  0x55   :  { %943 = vmatprep.subr.bf16.mxu0 %v1141_v1  ;;  %v989_v56 = vpack.c.bf16 %v435_v55, %v434_v54 }
  0x57   :  { %924 = vmatpush3.bf16.msra.mxu1 %v923_v28  ;;  %v343_v28 = vld [vmem:[#allocation5 + $0x178] sm:$0xff] }
  0x58   :  { %949 = vmatprep.subr.bf16.mxu1 %v1141_v1  ;;  %945 = vmatpush3.bf16.msra.mxu0 %v944_v57  ;;  %v971_v30 = vpack.c.bf16 %v344_v29, %v343_v28  ;;  %v436_v57 = vld [vmem:[#allocation5 + $0x1e8] sm:$0xff]  ;;  %v533_v29 = vld [vmem:[#allocation5 + $0x278] sm:$0xff] }
  0x59   :  { %946 = vmatprep.subr.bf16.mxu0 %v1141_v1 }
  0x5c   :  { %948 = vmatpush3.bf16.msra.mxu0 %v947_v60  ;;  %v439_v60 = vld [vmem:[#allocation5 + $0x200] sm:$0xff] }
  0x5d   :  { %973 = vmatprep.subr.bf16.mxu0 %v1141_v1  ;;  %v995_v61 = vpack.c.bf16 %v439_v60, %v438_v59 }
 0x10d   :  { %v131_v39 = vpop.f32.mrb[0].mxu0 }
 0x10e   :  { %v132_v40 = vadd.f32 %v627_v38, %v131_v39  ;;  %v725_v41 = vpop.f32.mrb[1].mxu0  ;;  %v429_v38 = vld [vmem:[#allocation5 + $0x1b0] sm:$0xff] }
 0x10f   :  { %v980_v39 = vpack.c.bf16 %v429_v38, %v428_v37 }
 0x110   :  { %v135_v42 = vmul.f32 0.5, %v132_v40  ;;  %v630_v40 = vld [vmem:[#allocation7 + $0x2] ss:$0 sm:$0xff] }
 0x112   :  { %1030 = vtanh.f32 %v135_v42 }
 0x11c   :  { %v1031_v43 = vpop.eup %1030 }
 0x11d   :  { %v137_v44 = vadd.f32 1.0, %v1031_v43 }
 0x11f   :  { %v138_v45 = vmul.f32 %v137_v44, %v135_v42 }
 0x121   :  { %759 = vmatmul.mubr.f32.vlgmr.msra.gmra.mrb[0].mxu1 %v138_v45 }
 0x122   :  { %828 = vmatprep.mubr.msk.f32.mxu1 %vm1140_vm0, %v1139_v0  ;;  %951 = vmatpush3.bf16.msra.mxu1 %v950_v2  ;;  %v521_v2 = vld [vmem:[#allocation5 + $0x218] sm:$0xff] }
 0x123   :  { %952 = vmatprep.subr.bf16.mxu1 %v1141_v1 }
 0x126   :  { %954 = vmatpush3.bf16.msra.mxu1 %v953_v4  ;;  %v522_v4 = vld [vmem:[#allocation5 + $0x220] sm:$0xff] }
 0x127   :  { %955 = vmatprep.subr.bf16.mxu1 %v1141_v1  ;;  %v1001_v5 = vpack.c.bf16 %v522_v4, %v521_v2 }
 0x12a   :  { %957 = vmatpush3.bf16.msra.mxu1 %v956_v7  ;;  %v524_v7 = vld [vmem:[#allocation5 + $0x230] sm:$0xff] }
 0x12b   :  { %958 = vmatprep.subr.bf16.mxu1 %v1141_v1 }
 0x12e   :  { %960 = vmatpush3.bf16.msra.mxu1 %v959_v18  ;;  %v526_v18 = vld [vmem:[#allocation5 + $0x240] sm:$0xff] }
 0x12f   :  { %961 = vmatprep.subr.bf16.mxu1 %v1141_v1  ;;  %v1007_v19 = vpack.c.bf16 %v526_v18, %v525_v17 }
 0x132   :  { %963 = vmatpush3.bf16.msra.mxu1 %v962_v21  ;;  %v528_v21 = vld [vmem:[#allocation5 + $0x250] sm:$0xff] }
 0x133   :  { %964 = vmatprep.subr.bf16.mxu1 %v1141_v1  ;;  %v1010_v22 = vpack.c.bf16 %v528_v21, %v527_v20 }
 0x136   :  { %966 = vmatpush3.bf16.msra.mxu1 %v965_v24  ;;  %v530_v24 = vld [vmem:[#allocation5 + $0x260] sm:$0xff] }
 0x137   :  { %967 = vmatprep.subr.bf16.mxu1 %v1141_v1  ;;  %v1013_v25 = vpack.c.bf16 %v530_v24, %v529_v23 }
 0x13a   :  { %969 = vmatpush3.bf16.msra.mxu1 %v968_v27  ;;  %v532_v27 = vld [vmem:[#allocation5 + $0x270] sm:$0xff] }
 0x13b   :  { %970 = vmatprep.subr.bf16.mxu1 %v1141_v1  ;;  %v1016_v28 = vpack.c.bf16 %v532_v27, %v531_v26 }
 0x13e   :  { %972 = vmatpush3.bf16.msra.mxu1 %v971_v30  ;;  %v534_v30 = vld [vmem:[#allocation5 + $0x280] sm:$0xff] }
 0x13f   :  { %997 = vmatprep.subr.bf16.mxu1 %v1141_v1  ;;  %v1019_v31 = vpack.c.bf16 %v534_v30, %v533_v29 }
 0x1f4   :  { %v226_v9 = vpop.f32.mrb[0].mxu1 }
 0x1f5   :  { %v227_v10 = vadd.f32 %v629_v8, %v226_v9  ;;  %v760_v11 = vpop.f32.mrb[1].mxu1  ;;  %v1004_v8 = vpack.c.bf16 %v524_v7, %v523_v6  ;;  %v631_v9 = vld [vmem:[#allocation7 + $0x3] ss:$0 sm:$0xff] }
 0x1f7   :  { %v230_v12 = vmul.f32 0.5, %v227_v10 }
 0x1f9   :  { %1032 = vtanh.f32 %v230_v12 }
 0x203   :  { %v1033_v13 = vpop.eup %1032 }
 0x204   :  { %v232_v14 = vadd.f32 1.0, %v1033_v13 }
 0x206   :  { %v233_v15 = vmul.f32 %v232_v14, %v230_v12 }
 0x208   :  { %794 = vmatmul.mubr.f32.vlgmr.msra.gmra.mrb[2].mxu0 %v233_v15 }
 0x209   :  { %863 = vmatprep.mubr.msk.f32.mxu0 %vm1140_vm0, %v1139_v0  ;;  %975 = vmatpush3.bf16.msra.mxu0 %v974_v34 }
 0x20a   :  { %976 = vmatprep.subr.bf16.mxu0 %v1141_v1 }
 0x20d   :  { %978 = vmatpush3.bf16.msra.mxu0 %v977_v36 }
 0x20e   :  { %979 = vmatprep.subr.bf16.mxu0 %v1141_v1 }
 0x211   :  { %981 = vmatpush3.bf16.msra.mxu0 %v980_v39 }
 0x212   :  { %982 = vmatprep.subr.bf16.mxu0 %v1141_v1 }
 0x215   :  { %984 = vmatpush3.bf16.msra.mxu0 %v983_v50 }
 0x216   :  { %985 = vmatprep.subr.bf16.mxu0 %v1141_v1 }
 0x219   :  { %987 = vmatpush3.bf16.msra.mxu0 %v986_v53 }
 0x21a   :  { %988 = vmatprep.subr.bf16.mxu0 %v1141_v1 }
 0x21d   :  { %990 = vmatpush3.bf16.msra.mxu0 %v989_v56 }
 0x21e   :  { %991 = vmatprep.subr.bf16.mxu0 %v1141_v1 }
 0x2db   :  { %v321_v41 = vpop.f32.mrb[2].mxu0 }
 0x2dc   :  { %v322_v42 = vadd.f32 %v630_v40, %v321_v41  ;;  %v795_v43 = vpop.f32.mrb[3].mxu0  ;;  %v633_v40 = vld [vmem:[#allocation7 + $0x5] ss:$0 sm:$0xff] }
 0x2de   :  { %v325_v44 = vmul.f32 0.5, %v322_v42 }
 0x2e0   :  { %1034 = vtanh.f32 %v325_v44 }
 0x2ea   :  { %v1035_v45 = vpop.eup %1034 }
 0x2eb   :  { %v327_v46 = vadd.f32 1.0, %v1035_v45 }
 0x2ed   :  { %v328_v47 = vmul.f32 %v327_v46, %v325_v44 }
 0x2ef   :  { %829 = vmatmul.mubr.f32.vlgmr.msra.gmra.mrb[2].mxu1 %v328_v47 }
 0x2f0   :  { %898 = vmatprep.mubr.msk.f32.mxu1 %vm1140_vm0, %v1139_v0  ;;  %v437_v0 = vld [vmem:[#allocation5 + $0x1f0] sm:$0xff]  ;;  %999 = vmatpush3.bf16.msra.mxu1 %v998_v3 }
 0x2f1   :  { %v992_v58 = vpack.c.bf16 %v437_v0, %v436_v57  ;;  %1000 = vmatprep.subr.bf16.mxu1 %v1141_v1 }
 0x2f3   :  { %993 = vmatpush3.bf16.msra.mxu0 %v992_v58 }
 0x2f4   :  { %994 = vmatprep.subr.bf16.mxu0 %v1141_v1  ;;  %1002 = vmatpush3.bf16.msra.mxu1 %v1001_v5 }
 0x2f5   :  { %1003 = vmatprep.subr.bf16.mxu1 %v1141_v1 }
 0x2f7   :  { %996 = vmatpush3.bf16.msra.mxu0 %v995_v61 }
 0x2f8   :  { %1005 = vmatpush3.bf16.msra.mxu1 %v1004_v8 }
 0x2f9   :  { %1006 = vmatprep.subr.bf16.mxu1 %v1141_v1 }
 0x2fc   :  { %1008 = vmatpush3.bf16.msra.mxu1 %v1007_v19 }
 0x2fd   :  { %1009 = vmatprep.subr.bf16.mxu1 %v1141_v1 }
 0x300   :  { %1011 = vmatpush3.bf16.msra.mxu1 %v1010_v22 }
 0x301   :  { %1012 = vmatprep.subr.bf16.mxu1 %v1141_v1 }
 0x304   :  { %1014 = vmatpush3.bf16.msra.mxu1 %v1013_v25 }
 0x305   :  { %1015 = vmatprep.subr.bf16.mxu1 %v1141_v1 }
 0x308   :  { %1017 = vmatpush3.bf16.msra.mxu1 %v1016_v28 }
 0x309   :  { %1018 = vmatprep.subr.bf16.mxu1 %v1141_v1 }
 0x30c   :  { %1020 = vmatpush3.bf16.msra.mxu1 %v1019_v31 }
 0x3c2   :  { %v416_v10 = vpop.f32.mrb[2].mxu1 }
 0x3c3   :  { %v417_v11 = vadd.f32 %v631_v9, %v416_v10  ;;  %v830_v12 = vpop.f32.mrb[3].mxu1 }
 0x3c5   :  { %v420_v13 = vmul.f32 0.5, %v417_v11 }
 0x3c7   :  { %1036 = vtanh.f32 %v420_v13 }
 0x3d1   :  { %v1037_v14 = vpop.eup %1036 }
 0x3d2   :  { %v422_v15 = vadd.f32 1.0, %v1037_v14 }
 0x3d4   :  { %v423_v16 = vmul.f32 %v422_v15, %v420_v13 }
 0x3d6   :  { %864 = vmatmul.mubr.f32.vlgmr.msra.gmra.mrb[4].mxu0 %v423_v16 }
 0x4a9   :  { %v511_v33 = vpop.f32.mrb[4].mxu0 }
 0x4aa   :  { %v512_v34 = vadd.f32 %v632_v32, %v511_v33  ;;  %v865_v35 = vpop.f32.mrb[5].mxu0 }
 0x4ac   :  { %v515_v36 = vmul.f32 0.5, %v512_v34 }
 0x4ae   :  { %1038 = vtanh.f32 %v515_v36 }
 0x4b8   :  { %v1039_v37 = vpop.eup %1038 }
 0x4b9   :  { %v517_v38 = vadd.f32 1.0, %v1039_v37 }
 0x4bb   :  { %v518_v39 = vmul.f32 %v517_v38, %v515_v36 }
 0x4bd   :  { %899 = vmatmul.mubr.f32.vlgmr.msra.gmra.mrb[4].mxu1 %v518_v39 }
 0x590   :  { %v606_v41 = vpop.f32.mrb[4].mxu1 }
 0x591   :  { %v607_v42 = vadd.f32 %v633_v40, %v606_v41  ;;  %v900_v1 = vpop.f32.mrb[5].mxu1 }
 0x593   :  { %610 = vst [vmem:[#allocation8] sm:$0x3] %v607_v42 }
 0x594   :  { %1117 = shalt.err (!%p1114_p0)
}
 0x595   :  { %s1118_s25 = scalar_lea.hbm %s1267_s3, 32 }
 0x596   :  { %p1119_p1 = scmp.ne.s32.totalorder %s1267_s3, %s1118_s25  ;;  %p1122_p2 = scmp.lt.u32.totalorder %s1118_s25, %s1267_s3 }
 0x598   :  { %p1124_p3 = pnand %p1122_p2, %p1119_p1 }
 0x59a   :  { %1127 = shalt.err (!%p1124_p3)
}
 0x59b   :  { %620 = dma.vmem_to_hbm [thread:$0]  %s618_s21, 32, %s1267_s3, [#allocation4]  }
 0x59c   :  { %1132 = dma.done.wait [#allocation4], 32  }
 0x59d   :  { %1133 = vsyncadd [#allocation4], 4294967264 }
 0x59e   :  { %624 = vsyncpa [#allocation3], 1 }
 0x59f   :  { %625 = vsyncpa [#allocation6], 1 }
 0x5a0   :  { %626 = vsyncpa [#allocation4], 1 }

</bundles_post_ra>
